<compile_context>
chip_gen: v7x
topology: tpu7x:2x2x1
jax: 0.10.0
libtpu: 0.0.40
codegen_flags: <defaults>
</compile_context>

<pallas_src>
import numpy as np
import jax
import jax.numpy as jnp
from jax import lax
from jax.experimental import pallas as pl
from jax.experimental.pallas import tpu as pltpu

# Keep f32 matmuls at full precision both inside the kernel trace and in the
# pure-JAX reference so the correctness check is apples-to-apples.
jax.config.update("jax_default_matmul_precision", "highest")


def _round_up(x, m):
    return (x + m - 1) // m * m


def residential_transnet_forward(params, state_embeddings, alpha, context):
    """Forward of ResidentialTransNet (use_histogram=True, use_lstm=False, eval mode).

    state_embeddings: (S, E) f32, alpha: (B, S) f32, context: (B, C) f32 -> (B, S) f32.
    """
    # TODO(synk): use_lstm branch (nn.LSTMCell hidden state carried across timesteps via
    # update_lstm) is stateful and outside this forward; it would add lstm_hidden columns
    # to the activation slab exactly like `context`.
    # TODO(synk): in the HMM alpha-recursion call-site, hoist the timestep loop into the
    # kernel (T as a grid axis / fori_loop with constant weight index_maps + alpha carried
    # in VMEM scratch) so the parameter slab stays VMEM-resident instead of re-DMAing and
    # re-paying launch latency every step.
    W_cat, b_cat = params["W_cat"], params["b_cat"]
    W1, b1 = params["W1"], params["b1"]
    W2, b2 = params["W2"], params["b2"]

    S, E = state_embeddings.shape
    B, C = context.shape
    H = W_cat.shape[0]
    EC = E + C
    assert S >= 2, "num_state must be >= 2"
    f32 = jnp.float32

    # ---- wrapper-side layout plumbing (pure XLA glue, no compute hoisted out) ----
    # (1) single activation slab: the PyTorch repeat(B,1,1) + repeat-over-states concat,
    #     flattened to (B*S, E+C) so the first Linear is ONE matmul in-kernel.
    x_cat = jnp.concatenate(
        [jnp.tile(state_embeddings.astype(f32), (B, 1)),
         jnp.repeat(context.astype(f32), S, axis=0)], axis=1)            # (B*S, EC)
    alpha_col = alpha.astype(f32).reshape(B * S, 1)

    # (2) single parameter slab: weights (transposed) + biases stacked along the sublane
    #     axis at 8-aligned row offsets; W2/b2 zero-padded from S-1 to S columns (the
    #     dummy column only ever reaches the masked diagonal in-kernel).
    Wc = max(H, S)
    R1 = _round_up(EC, 8)                 # W1.T rows start
    R2 = R1 + _round_up(H, 8)             # W2.T rows start
    R3 = R2 + _round_up(H, 8)             # b_cat row (8-aligned)
    RB1, RB2 = R3 + 8, R3 + 16            # b1 / b2 rows (8-aligned)
    Rtot = R3 + 24
    wb = jnp.zeros((Rtot, Wc), f32)
    wb = wb.at[:EC, :H].set(W_cat.T.astype(f32))
    wb = wb.at[R1:R1 + H, :H].set(W1.T.astype(f32))
    wb = wb.at[R2:R2 + H, :S - 1].set(W2.T.astype(f32))
    wb = wb.at[R3, :H].set(b_cat.astype(f32))
    wb = wb.at[RB1, :H].set(b1.astype(f32))
    wb = wb.at[RB2, :S - 1].set(b2.astype(f32))

    pow2 = (S & (S - 1)) == 0

    def kernel(x_ref, alpha_ref, wb_ref, out_ref):
        # ---- fused MLP (cat_layer + transition_layer); dropout = eval-mode identity ----
        h1 = jnp.tanh(jnp.dot(x_ref[...], wb_ref[0:EC, 0:H],
                              preferred_element_type=f32)
                      + wb_ref[R3:R3 + 1, 0:H])                           # (B*S, H)
        h2 = jnp.tanh(jnp.dot(h1, wb_ref[R1:R1 + H, 0:H],
                              preferred_element_type=f32)
                      + wb_ref[RB1:RB1 + 1, 0:H])                         # (B*S, H)
        logits = (jnp.dot(h2, wb_ref[R2:R2 + H, 0:S],
                          preferred_element_type=f32)
                  + wb_ref[RB2:RB2 + 1, 0:S])                             # (B*S, S)

        # ---- zero-diagonal transition matrix via masked softmax (gather-free) ----
        # shifted[:, t] = logits[:, t-1]; the wrapped column 0 (dummy logit) only ever
        # lands on the masked diagonal.
        shifted = jnp.concatenate([logits[:, S - 1:S], logits[:, :S - 1]], axis=1)

        col = lax.broadcasted_iota(jnp.int32, (B * S, S), 1)              # target state t
        rowi = lax.broadcasted_iota(jnp.int32, (B * S, S), 0)
        row_state = (rowi & (S - 1)) if pow2 else lax.rem(rowi, S)        # source state s
        valid = col != row_state
        sel = jnp.where(col < row_state, logits, shifted)   # t<s -> logits[s,t]; t>s -> logits[s,t-1]

        # Each row's valid entries are exactly its S-1 original logits (permuted), so this
        # equals softmax(logits,-1) followed by the PyTorch gather. S>=2 guarantees every
        # row has >=1 valid entry, so the -inf sentinel can never yield a NaN row.
        m = jnp.max(jnp.where(valid, sel, -jnp.inf), axis=1, keepdims=True)
        e = jnp.where(valid, jnp.exp(sel - m), 0.0)                       # zero diagonal
        denom = jnp.sum(e, axis=1, keepdims=True)

        # Fold the softmax 1/denom into the alpha row-scale (exact; pure row scaling).
        w = alpha_ref[...] * pl.reciprocal(denom, approx=False)          # (B*S, 1)
        weighted = w * e                                                 # (B*S, S)

        # out[b,t] = sum_s alpha[b,s] * mat[b,s,t]: one small MXU matmul against a
        # block-indicator built from iota compares (MXU is idle here; avoids B serialized
        # sublane reductions + a sublane concat on the kernel tail).
        bidx = lax.broadcasted_iota(jnp.int32, (B, B * S), 0)
        ridx = lax.broadcasted_iota(jnp.int32, (B, B * S), 1)
        lo = bidx * S
        ind = jnp.logical_and(ridx >= lo, ridx < lo + S).astype(f32)     # (B, B*S)
        out_ref[...] = jnp.dot(ind, weighted,
                               preferred_element_type=f32).astype(out_ref.dtype)

    vmem = pl.BlockSpec(memory_space=pltpu.MemorySpace.VMEM)
    # Gridless call: whole working set is a few KB of VMEM; no per-step grid scaffolding.
    # For large B, add a leading grid axis over batch marked "parallel" (v7x megacore).
    return pl.pallas_call(
        kernel,
        out_shape=jax.ShapeDtypeStruct((B, S), alpha.dtype),
        in_specs=[vmem, vmem, vmem],
        out_specs=vmem,
    )(x_cat, alpha_col, wb)


def _reference_forward(params, state_embeddings, alpha, context):
    """Pure-JAX mirror of the PyTorch forward (gather-based), for verification."""
    W_cat, b_cat = params["W_cat"], params["b_cat"]
    W1, b1 = params["W1"], params["b1"]
    W2, b2 = params["W2"], params["b2"]
    S, E = state_embeddings.shape
    B, C = context.shape

    e = jnp.concatenate(
        [jnp.broadcast_to(state_embeddings[None], (B, S, E)),
         jnp.broadcast_to(context[:, None, :], (B, S, C))], axis=-1)
    h1 = jnp.tanh(e @ W_cat.T + b_cat)
    h2 = jnp.tanh(h1 @ W1.T + b1)
    logits = h2 @ W2.T + b2                                      # (B, S, S-1)
    Wsm = jax.nn.softmax(logits, axis=-1)
    mat_raw = jnp.concatenate([jnp.zeros((B, S, 1), Wsm.dtype), Wsm], axis=-1)

    idx = np.zeros((S, S), dtype=np.int32)
    idx[0, :] = np.arange(S)
    for s in range(1, S):
        idx[s, :s] = np.arange(1, s + 1)
        idx[s, s + 1:] = np.arange(s + 1, S)
    idx_b = jnp.broadcast_to(jnp.asarray(idx)[None], (B, S, S))
    mat = jnp.take_along_axis(mat_raw, idx_b, axis=-1)
    return jnp.einsum('bs,bst->bt', alpha, mat)


if __name__ == "__main__":
    # config: num_state=8, embedding_size=16, histogram_encoding_size=8,
    #         transition_hidden_size=32, use_histogram=True, use_lstm=False
    S, E, C, H = 8, 16, 8, 32
    B = 4

    key = jax.random.PRNGKey(0)
    ks = jax.random.split(key, 9)
    params = {
        "W_cat": jax.random.normal(ks[0], (H, E + C), jnp.float32) / np.sqrt(E + C),
        "b_cat": 0.1 * jax.random.normal(ks[1], (H,), jnp.float32),
        "W1":    jax.random.normal(ks[2], (H, H), jnp.float32) / np.sqrt(H),
        "b1":    0.1 * jax.random.normal(ks[3], (H,), jnp.float32),
        "W2":    jax.random.normal(ks[4], (S - 1, H), jnp.float32) / np.sqrt(H),
        "b2":    0.1 * jax.random.normal(ks[5], (S - 1,), jnp.float32),
    }
    state_embeddings = jax.random.normal(ks[6], (S, E), jnp.float32)
    context = jax.random.normal(ks[7], (B, C), jnp.float32)
    alpha = jax.nn.softmax(jax.random.normal(ks[8], (B, S), jnp.float32), axis=-1)

    out = residential_transnet_forward(params, state_embeddings, alpha, context)
    out = jax.block_until_ready(out)

    ref = _reference_forward(params, state_embeddings, alpha, context)
    assert out.shape == (B, S)
    assert np.allclose(np.asarray(out), np.asarray(ref), rtol=1e-4, atol=1e-4), (
        np.abs(np.asarray(out) - np.asarray(ref)).max())

    print("KERNEL_OK")
</pallas_src>

<mosaic_0001>
module attributes {stable_mosaic.version = 11 : i64} {
  func.func @kernel(%arg0: memref<32x24xf32, #tpu.memory_space<vmem>>, %arg1: memref<32x1xf32, #tpu.memory_space<vmem>>, %arg2: memref<112x32xf32, #tpu.memory_space<vmem>>, %arg3: memref<4x8xf32, #tpu.memory_space<vmem>>) attributes {dimension_semantics = [], scalar_prefetch = 0 : i64, scratch_operands = 0 : i64, tpu.core_type = #tpu.core_type<tc>} {
    %c0 = arith.constant 0 : index
    %c0_0 = arith.constant 0 : index
    %0 = vector.load %arg0[%c0, %c0_0] : memref<32x24xf32, #tpu.memory_space<vmem>>, vector<32x24xf32>
    %c0_1 = arith.constant 0 : index
    %c0_2 = arith.constant 0 : index
    %1 = vector.load %arg2[%c0_1, %c0_2] : memref<112x32xf32, #tpu.memory_space<vmem>>, vector<24x32xf32>
    %cst = arith.constant dense<0.000000e+00> : vector<32x32xf32>
    %2 = tpu.matmul %0, %1, %cst {dimension_numbers = #tpu.dot_dimension_numbers<[1], [0], [0], [1], [0, 0, 1, 1], [], []>, precision = #tpu.contract_precision<fp32>} : vector<32x24xf32>, vector<24x32xf32>, vector<32x32xf32> -> vector<32x32xf32>
    %c88 = arith.constant 88 : index
    %c0_3 = arith.constant 0 : index
    %3 = vector.load %arg2[%c88, %c0_3] : memref<112x32xf32, #tpu.memory_space<vmem>>, vector<1x32xf32>
    %4 = vector.broadcast %3 : vector<1x32xf32> to vector<32x32xf32>
    %5 = arith.addf %2, %4 : vector<32x32xf32>
    %6 = math.tanh %5 : vector<32x32xf32>
    %c24 = arith.constant 24 : index
    %c0_4 = arith.constant 0 : index
    %7 = vector.load %arg2[%c24, %c0_4] : memref<112x32xf32, #tpu.memory_space<vmem>>, vector<32x32xf32>
    %cst_5 = arith.constant dense<0.000000e+00> : vector<32x32xf32>
    %8 = tpu.matmul %6, %7, %cst_5 {dimension_numbers = #tpu.dot_dimension_numbers<[1], [0], [0], [1], [0, 0, 1, 1], [], []>, precision = #tpu.contract_precision<fp32>} : vector<32x32xf32>, vector<32x32xf32>, vector<32x32xf32> -> vector<32x32xf32>
    %c96 = arith.constant 96 : index
    %c0_6 = arith.constant 0 : index
    %9 = vector.load %arg2[%c96, %c0_6] : memref<112x32xf32, #tpu.memory_space<vmem>>, vector<1x32xf32>
    %10 = vector.broadcast %9 : vector<1x32xf32> to vector<32x32xf32>
    %11 = arith.addf %8, %10 : vector<32x32xf32>
    %12 = math.tanh %11 : vector<32x32xf32>
    %c56 = arith.constant 56 : index
    %c0_7 = arith.constant 0 : index
    %13 = vector.load %arg2[%c56, %c0_7] : memref<112x32xf32, #tpu.memory_space<vmem>>, vector<32x8xf32>
    %cst_8 = arith.constant dense<0.000000e+00> : vector<32x8xf32>
    %14 = tpu.matmul %12, %13, %cst_8 {dimension_numbers = #tpu.dot_dimension_numbers<[1], [0], [0], [1], [0, 0, 1, 1], [], []>, precision = #tpu.contract_precision<fp32>} : vector<32x32xf32>, vector<32x8xf32>, vector<32x8xf32> -> vector<32x8xf32>
    %c104 = arith.constant 104 : index
    %c0_9 = arith.constant 0 : index
    %15 = vector.load %arg2[%c104, %c0_9] : memref<112x32xf32, #tpu.memory_space<vmem>>, vector<1x8xf32>
    %16 = vector.broadcast %15 : vector<1x8xf32> to vector<32x8xf32>
    %17 = arith.addf %14, %16 : vector<32x8xf32>
    %18 = vector.extract_strided_slice %17 {offsets = [0, 7], sizes = [32, 1], strides = [1, 1]} : vector<32x8xf32> to vector<32x1xf32>
    %19 = vector.extract_strided_slice %17 {offsets = [0, 0], sizes = [32, 7], strides = [1, 1]} : vector<32x8xf32> to vector<32x7xf32>
    %20 = tpu.concatenate %18, %19 in 1 : vector<32x1xf32>, vector<32x7xf32> -> vector<32x8xf32>
    %21 = tpu.iota {dimensions = array<i32: 1>} : vector<32x8xi32>
    %22 = tpu.iota {dimensions = array<i32: 0>} : vector<32x8xi32>
    %c7_i32 = arith.constant 7 : i32
    %23 = vector.broadcast %c7_i32 : i32 to vector<32x8xi32>
    %24 = arith.andi %22, %23 : vector<32x8xi32>
    %25 = arith.cmpi ne, %21, %24 : vector<32x8xi32>
    %26 = arith.cmpi slt, %21, %24 : vector<32x8xi32>
    %27 = arith.select %26, %17, %20 : vector<32x8xi1>, vector<32x8xf32>
    %cst_10 = arith.constant 0xFF800000 : f32
    %28 = vector.broadcast %cst_10 : f32 to vector<32x8xf32>
    %29 = arith.select %25, %27, %28 : vector<32x8xi1>, vector<32x8xf32>
    %cst_11 = arith.constant dense<0xFF800000> : vector<32xf32>
    %30 = vector.multi_reduction <maximumf>, %29, %cst_11 [1] : vector<32x8xf32> to vector<32xf32>
    %31 = vector.shape_cast %30 : vector<32xf32> to vector<32x1xf32>
    %32 = vector.broadcast %31 : vector<32x1xf32> to vector<32x8xf32>
    %33 = arith.subf %27, %32 : vector<32x8xf32>
    %34 = math.exp %33 : vector<32x8xf32>
    %cst_12 = arith.constant 0.000000e+00 : f32
    %35 = vector.broadcast %cst_12 : f32 to vector<32x8xf32>
    %36 = arith.select %25, %34, %35 : vector<32x8xi1>, vector<32x8xf32>
    %cst_13 = arith.constant dense<0.000000e+00> : vector<32xf32>
    %37 = vector.multi_reduction <add>, %36, %cst_13 [1] : vector<32x8xf32> to vector<32xf32>
    %38 = vector.shape_cast %37 : vector<32xf32> to vector<32x1xf32>
    %c0_14 = arith.constant 0 : index
    %c0_15 = arith.constant 0 : index
    %39 = vector.load %arg1[%c0_14, %c0_15] : memref<32x1xf32, #tpu.memory_space<vmem>>, vector<32x1xf32>
    %40 = tpu.reciprocal %38 : vector<32x1xf32> -> vector<32x1xf32>
    %41 = arith.mulf %39, %40 : vector<32x1xf32>
    %42 = vector.broadcast %41 : vector<32x1xf32> to vector<32x8xf32>
    %43 = arith.mulf %42, %36 : vector<32x8xf32>
    %44 = tpu.iota {dimensions = array<i32: 0>} : vector<4x32xi32>
    %45 = tpu.iota {dimensions = array<i32: 1>} : vector<4x32xi32>
    %c8_i32 = arith.constant 8 : i32
    %46 = vector.broadcast %c8_i32 : i32 to vector<4x32xi32>
    %47 = arith.muli %44, %46 : vector<4x32xi32>
    %48 = arith.cmpi sge, %45, %47 : vector<4x32xi32>
    %c8_i32_16 = arith.constant 8 : i32
    %49 = vector.broadcast %c8_i32_16 : i32 to vector<4x32xi32>
    %50 = arith.addi %47, %49 : vector<4x32xi32>
    %51 = arith.cmpi slt, %45, %50 : vector<4x32xi32>
    %52 = arith.andi %48, %51 : vector<4x32xi1>
    %53 = arith.extui %52 : vector<4x32xi1> to vector<4x32xi32>
    %54 = arith.sitofp %53 : vector<4x32xi32> to vector<4x32xf32>
    %cst_17 = arith.constant dense<0.000000e+00> : vector<4x8xf32>
    %55 = tpu.matmul %54, %43, %cst_17 {dimension_numbers = #tpu.dot_dimension_numbers<[1], [0], [0], [1], [0, 0, 1, 1], [], []>, precision = #tpu.contract_precision<fp32>} : vector<4x32xf32>, vector<32x8xf32>, vector<4x8xf32> -> vector<4x8xf32>
    %c0_18 = arith.constant 0 : index
    %c0_19 = arith.constant 0 : index
    %56 = vector.load %arg3[%c0_18, %c0_19] : memref<4x8xf32, #tpu.memory_space<vmem>>, vector<4x8xf32>
    tpu.vector_store %arg3[%c0_18, %c0_19], %55 {strides = array<i32>} : memref<4x8xf32, #tpu.memory_space<vmem>>, vector<4x8xf32>,
    return
  }
}

</mosaic_0001>

<bundles_post_ra>
// kernel: tpu_custom_call.1
= control target key start
LH: loop header
LB: loop body
LE: loop exit
PB: predicated region body
PF: predicated region fallthrough
CT: control target
= control target key end

     0   :  { %vm27_vm0 = vcmask 195584   ;;  %s3677_s0 = inlined_call_operand.vmem [shape: f32[32,24], index: 0, kind: input, shape index: {}]   ;;  %s3678_s1 = inlined_call_operand.vmem [shape: f32[32,1], index: 1, kind: input, shape index: {}]   ;;  %s3679_s2 = inlined_call_operand.vmem [shape: f32[112,32], index: 2, kind: input, shape index: {}]   ;;  %s3680_s3 = inlined_call_operand.hbm [shape: f32[4,8], index: 3, kind: output, shape index: {}]  }
   0x1   :  { %v19_v0 = vld [vmem:[%s3679_s2] sm:$0xff]  ;;  %v20_v1 = vld [vmem:[%s3679_s2 + $0x8] sm:$0xff]  ;;  %v21_v2 = vld [vmem:[%s3679_s2 + $0x10] sm:$0xff] }
   0x2   :  { %v41_v3 = vand.u32 4294901760, %v19_v0  ;;  %v44_v4 = vand.u32 4294901760, %v20_v1  ;;  %v3388_v5 = vand.u32 4294901760, %v21_v2  ;;  %v15_v6 = vld [vmem:[%s3677_s0] sm:$0xff]  ;;  %v16_v7 = vld [vmem:[%s3677_s0 + $0x8] sm:$0xff]  ;;  %v17_v8 = vld [vmem:[%s3677_s0 + $0x10] sm:$0xff] }
   0x3   :  { %v29_v9 = vsel %vm27_vm0, %v15_v6, 0  ;;  %v32_v10 = vsel %vm27_vm0, %v16_v7, 0  ;;  %v35_v11 = vsel %vm27_vm0, %v17_v8, 0  ;;  %v18_v12 = vld [vmem:[%s3677_s0 + $0x18] sm:$0xff] }
   0x4   :  { %v3405_v13 = vpack.c.bf16 %v44_v4, %v41_v3  ;;  %v3407_v14 = vand.u32 4294901760, %v29_v9  ;;  %v3409_v15 = vand.u32 4294901760, %v32_v10  ;;  %v150_v16 = vsub.f32 %v19_v0, %v41_v3 }
   0x5   :  { %8 = vsyncpa [#allocation3], 0  ;;  %v157_v17 = vsub.f32 %v20_v1, %v44_v4  ;;  %v3411_v18 = vand.u32 4294901760, %v35_v11  ;;  %v38_v19 = vsel %vm27_vm0, %v18_v12, 0  ;;  %v164_v20 = vsub.f32 %v21_v2, %v3388_v5  ;;  %v645_v50 = vld [vmem:[%s3679_s2 + $0x18] sm:$0xff]  ;;  %v646_v51 = vld [vmem:[%s3679_s2 + $0x20] sm:$0xff] }
   0x6   :  { %3050 = vmatprep.subr.bf16.mxu0 %v3405_v13  ;;  %v109_v21 = vsub.f32 %v29_v9, %v3407_v14  ;;  %v119_v22 = vsub.f32 %v32_v10, %v3409_v15  ;;  %v151_v23 = vand.u32 4294901760, %v150_v16  ;;  %v3418_v24 = vand.u32 4294901760, %v38_v19  ;;  %v647_v52 = vld [vmem:[%s3679_s2 + $0x28] sm:$0xff]  ;;  %v648_v55 = vld [vmem:[%s3679_s2 + $0x30] sm:$0xff]  ;;  %s3352_s20 = smov 1   ;;  %s3353_s21 = smov 121  }
   0x7   :  { %3052 = vmatpush3.bf16.msra.mxu0 %v3405_v13  ;;  %v158_v25 = vand.u32 4294901760, %v157_v17  ;;  %v129_v26 = vsub.f32 %v35_v11, %v3411_v18  ;;  %v165_v27 = vand.u32 4294901760, %v164_v20  ;;  %v3057_v48 = vpack.c.bf16 %v157_v17, %v150_v16 }
   0x8   :  { %2747 = vmatprep.subr.mxu0 %v3388_v5  ;;  %v110_v28 = vand.u32 4294901760, %v109_v21  ;;  %v120_v29 = vand.u32 4294901760, %v119_v22  ;;  %v152_v30 = vsub.f32 %v150_v16, %v151_v23  ;;  %v139_v31 = vsub.f32 %v38_v19, %v3418_v24 }
   0x9   :  { %v159_v32 = vsub.f32 %v157_v17, %v158_v25  ;;  %v130_v33 = vand.u32 4294901760, %v129_v26  ;;  %v166_v34 = vsub.f32 %v164_v20, %v165_v27  ;;  %v3065_v49 = vpack.c.bf16 %v158_v25, %v151_v23 }
   0xa   :  { %v111_v35 = vsub.f32 %v109_v21, %v110_v28  ;;  %v121_v36 = vsub.f32 %v119_v22, %v120_v29  ;;  %v153_v37 = vand.u32 4294901760, %v152_v30  ;;  %v140_v38 = vand.u32 4294901760, %v139_v31 }
   0xb   :  { %2748 = vmatpush3.msra.mxu0 %v3388_v5  ;;  %v160_v39 = vand.u32 4294901760, %v159_v32  ;;  %v131_v40 = vsub.f32 %v129_v26, %v130_v33  ;;  %v167_v46 = vand.u32 4294901760, %v166_v34  ;;  %v668_v53 = vand.u32 4294901760, %v645_v50 }
   0xc   :  { %v112_v41 = vand.u32 4294901760, %v111_v35  ;;  %v122_v42 = vand.u32 4294901760, %v121_v36  ;;  %v141_v43 = vsub.f32 %v139_v31, %v140_v38  ;;  %v671_v54 = vand.u32 4294901760, %v646_v51 }
   0xd   :  { %v3053_v44 = vpack.c.bf16 %v160_v39, %v153_v37  ;;  %v132_v45 = vand.u32 4294901760, %v131_v40  ;;  %v674_v56 = vand.u32 4294901760, %v647_v52  ;;  %v677_v57 = vand.u32 4294901760, %v648_v55 }
   0xe   :  { %2749 = vmatprep.mubr.f32.mxu0 %v112_v41  ;;  %v142_v47 = vand.u32 4294901760, %v141_v43  ;;  %v3457_v58 = vpack.c.bf16 %v671_v54, %v668_v53  ;;  %v778_v60 = vsub.f32 %v645_v50, %v668_v53  ;;  %v785_v61 = vsub.f32 %v646_v51, %v671_v54 }
   0xf   :  { %2750 = vmatmul.mubr.f32.vlgmr.msra.gmra.mrb[0].mxu0 %v122_v42  ;;  %3054 = vmatprep.subr.bf16.mxu0 %v3053_v44  ;;  %v3459_v59 = vpack.c.bf16 %v677_v57, %v674_v56  ;;  %v792_v2 = vsub.f32 %v647_v52, %v674_v56  ;;  %v799_v3 = vsub.f32 %v648_v55, %v677_v57  ;;  %vm654_vm1 = vcmask 261120   ;;  %v1285_v55 = vld [vmem:[%s3679_s2 + $0x38] sm:$0xff]  ;;  %v1286_v56 = vld [vmem:[%s3679_s2 + $0x40] sm:$0xff] }
  0x10   :  { %3056 = vmatpush3.bf16.msra.mxu0 %v3053_v44  ;;  %2752 = vmatprep.mubr.f32.mxu0 %v132_v45  ;;  %v779_v62 = vand.u32 4294901760, %v778_v60  ;;  %v786_v63 = vand.u32 4294901760, %v785_v61  ;;  %v1307_v57 = vand.u32 4294901760, %v1285_v55  ;;  %vm1948_vm2 = vcmask 7168  }
  0x11   :  { %2759 = vmatprep.subr.mxu0 %v167_v46  ;;  %3074 = vmatprep.subr.bf16.mxu1 %v3457_v58  ;;  %v793_v6 = vand.u32 4294901760, %v792_v2  ;;  %v800_v7 = vand.u32 4294901760, %v799_v3  ;;  %vm1980_vm5 = vcmask 64512   ;;  %vm3356_vm12 = vmmov 0  }
  0x12   :  { %3076 = vmatpush3.bf16.msra.mxu1 %v3457_v58  ;;  %v780_v0 = vsub.f32 %v778_v60, %v779_v62  ;;  %v787_v1 = vsub.f32 %v785_v61, %v786_v63  ;;  %v3465_v16 = vpack.c.bf16 %v786_v63, %v779_v62  ;;  %v1417_v62 = vsub.f32 %v1285_v55, %v1307_v57 }
  0x13   :  { %2753 = vmatmul.mubr.f32.gmra.mrb[2].mxu0 %v142_v47  ;;  %3078 = vmatprep.subr.bf16.mxu1 %v3459_v59  ;;  %v794_v9 = vsub.f32 %v792_v2, %v793_v6  ;;  %v801_v10 = vsub.f32 %v799_v3, %v800_v7  ;;  %v3467_v17 = vpack.c.bf16 %v800_v7, %v793_v6  ;;  %vm2552_vm0 = vcmask 60416  }
  0x14   :  { %2760 = vmatpush3.msra.mxu0 %v167_v46  ;;  %2761 = vmatprep.mubr.f32.mxu0 %v3407_v14  ;;  %v781_v4 = vand.u32 4294901760, %v780_v0 }
  0x15   :  { %3058 = vmatprep.subr.bf16.mxu0 %v3057_v48  ;;  %v795_v11 = vand.u32 4294901760, %v794_v9  ;;  %v802_v12 = vand.u32 4294901760, %v801_v10 }
  0x16   :  { %3080 = vmatpush3.bf16.msra.mxu1 %v3459_v59 }
  0x17   :  { %2762 = vmatmul.mubr.f32.vlgmr.msra.gmra.mrb[0].mxu0 %v3409_v15 }
  0x18   :  { %3060 = vmatpush3.bf16.msra.mxu0 %v3057_v48  ;;  %2764 = vmatprep.mubr.f32.mxu0 %v3411_v18 }
  0x19   :  { %2771 = vmatprep.subr.mxu0 %v164_v20 }
  0x1b   :  { %2765 = vmatmul.mubr.f32.gmra.mrb[2].mxu0 %v3418_v24 }
  0x1c   :  { %2772 = vmatpush3.msra.mxu0 %v164_v20  ;;  %2773 = vmatprep.mubr.f32.mxu0 %v109_v21 }
  0x1d   :  { %3062 = vmatprep.subr.bf16.mxu0 %v3405_v13 }
  0x1f   :  { %2774 = vmatmul.mubr.f32.vlgmr.msra.gmra.mrb[0].mxu0 %v119_v22 }
  0x20   :  { %3064 = vmatpush3.bf16.msra.mxu0 %v3405_v13  ;;  %2776 = vmatprep.mubr.f32.mxu0 %v129_v26 }
  0x21   :  { %2783 = vmatprep.subr.mxu0 %v3388_v5 }
  0x23   :  { %2777 = vmatmul.mubr.f32.gmra.mrb[2].mxu0 %v139_v31 }
  0x24   :  { %2784 = vmatpush3.msra.mxu0 %v3388_v5  ;;  %2785 = vmatprep.mubr.f32.mxu0 %v110_v28 }
  0x25   :  { %3066 = vmatprep.subr.bf16.mxu0 %v3065_v49 }
  0x27   :  { %2786 = vmatmul.mubr.f32.vlgmr.msra.gmra.mrb[0].mxu0 %v120_v29 }
  0x28   :  { %3068 = vmatpush3.bf16.msra.mxu0 %v3065_v49  ;;  %2788 = vmatprep.mubr.f32.mxu0 %v130_v33 }
  0x29   :  { %2795 = vmatprep.subr.mxu0 %v165_v27 }
  0x2b   :  { %2789 = vmatmul.mubr.f32.gmra.mrb[2].mxu0 %v140_v38 }
  0x2c   :  { %2796 = vmatpush3.msra.mxu0 %v165_v27  ;;  %2797 = vmatprep.mubr.f32.mxu0 %v3407_v14 }
  0x2d   :  { %3070 = vmatprep.subr.bf16.mxu0 %v3405_v13 }
  0x2f   :  { %2798 = vmatmul.mubr.f32.vlgmr.msra.gmra.mrb[0].mxu0 %v3409_v15 }
  0x30   :  { %3072 = vmatpush3.bf16.msra.mxu0 %v3405_v13  ;;  %2800 = vmatprep.mubr.f32.mxu0 %v3411_v18  ;;  %v3085_v13 = vpack.c.bf16 %v802_v12, %v795_v11 }
  0x31   :  { %2807 = vmatprep.subr.mxu0 %v3388_v5 }
  0x33   :  { %2801 = vmatmul.mubr.f32.gmra.mrb[2].mxu0 %v3418_v24 }
  0x34   :  { %2808 = vmatpush3.msra.mxu0 %v3388_v5  ;;  %2809 = vmatprep.mubr.f32.mxu0 %v3407_v14  ;;  %v788_v5 = vand.u32 4294901760, %v787_v1  ;;  %v3089_v14 = vpack.c.bf16 %v785_v61, %v778_v60  ;;  %v1288_v61 = vld [vmem:[%s3679_s2 + $0x50] sm:$0xff] }
  0x35   :  { %v1316_v1 = vand.u32 4294901760, %v1288_v61 }
  0x36   :  { %v3081_v8 = vpack.c.bf16 %v788_v5, %v781_v4 }
  0x37   :  { %2810 = vmatmul.mubr.f32.vlgmr.msra.gmra.mrb[0].mxu0 %v3409_v15  ;;  %v3093_v15 = vpack.c.bf16 %v799_v3, %v792_v2  ;;  %v1418_v2 = vand.u32 4294901760, %v1417_v62 }
  0x38   :  { %2812 = vmatprep.mubr.f32.mxu0 %v3411_v18  ;;  %3082 = vmatprep.subr.bf16.mxu1 %v3081_v8  ;;  %v2568_v18 = vld [vmem:[%s3679_s2 + $0x58] ss:$0 sm:$0xff] }
  0x39   :  { %v1419_v5 = vsub.f32 %v1417_v62, %v1418_v2 }
  0x3b   :  { %2813 = vmatmul.mubr.f32.gmra.mrb[2].mxu0 %v3418_v24  ;;  %v1420_v9 = vand.u32 4294901760, %v1419_v5  ;;  %v1953_v5 = vlaneseq }
 0x10a   :  { %v2811_v19 = vpop.f32.mrb[0].mxu0 }
 0x10b   :  { %v3205_v20 = vadd.f32 %v2811_v19, %v2568_v18  ;;  %v619_v21 = vpop.f32.mrb[1].mxu0 }
 0x10c   :  { %v3206_v22 = vadd.f32 %v2568_v18, %v619_v21 }
 0x10d   :  { %3296 = vtanh.f32 %v3205_v20 }
 0x10e   :  { %3298 = vtanh.f32 %v3206_v22  ;;  %v2814_v23 = vpop.f32.mrb[2].mxu0 }
 0x10f   :  { %v3207_v24 = vadd.f32 %v2814_v23, %v2568_v18  ;;  %v631_v25 = vpop.f32.mrb[3].mxu0  ;;  %v2569_v23 = vld [vmem:[%s3679_s2 + $0x60] ss:$0 sm:$0xff] }
 0x110   :  { %v3208_v26 = vadd.f32 %v2568_v18, %v631_v25 }
 0x111   :  { %3300 = vtanh.f32 %v3207_v24 }
 0x112   :  { %3302 = vtanh.f32 %v3208_v26 }
 0x117   :  { %v3297_v27 = vpop.eup %3296 }
 0x118   :  { %v3299_v28 = vpop.eup %3298  ;;  %v659_v29 = vsel %vm654_vm1, %v3297_v27, 0 }
 0x119   :  { %v656_v30 = vsel %vm654_vm1, %v3299_v28, 0  ;;  %v3474_v31 = vand.u32 4294901760, %v659_v29 }
 0x11a   :  { %v736_v32 = vand.u32 4294901760, %v656_v30 }
 0x11b   :  { %v3301_v33 = vpop.eup %3300  ;;  %v747_v34 = vsub.f32 %v659_v29, %v3474_v31 }
 0x11c   :  { %v3303_v35 = vpop.eup %3302  ;;  %v737_v36 = vsub.f32 %v656_v30, %v736_v32  ;;  %v665_v37 = vsel %vm654_vm1, %v3301_v33, 0 }
 0x11d   :  { %v748_v38 = vand.u32 4294901760, %v747_v34  ;;  %v662_v39 = vsel %vm654_vm1, %v3303_v35, 0  ;;  %v766_v40 = vand.u32 4294901760, %v665_v37 }
 0x11e   :  { %v738_v41 = vand.u32 4294901760, %v737_v36  ;;  %v756_v42 = vand.u32 4294901760, %v662_v39 }
 0x11f   :  { %v749_v43 = vsub.f32 %v747_v34, %v748_v38  ;;  %v767_v44 = vsub.f32 %v665_v37, %v766_v40 }
 0x120   :  { %v739_v45 = vsub.f32 %v737_v36, %v738_v41  ;;  %v757_v46 = vsub.f32 %v662_v39, %v756_v42 }
 0x121   :  { %v768_v47 = vand.u32 4294901760, %v767_v44  ;;  %v750_v50 = vand.u32 4294901760, %v749_v43 }
 0x122   :  { %v740_v48 = vand.u32 4294901760, %v739_v45  ;;  %v758_v49 = vand.u32 4294901760, %v757_v46 }
 0x123   :  { %v769_v51 = vsub.f32 %v767_v44, %v768_v47 }
 0x124   :  { %2823 = vmatprep.mubr.f32.mxu1 %v740_v48  ;;  %v759_v52 = vsub.f32 %v757_v46, %v758_v49 }
 0x125   :  { %2824 = vmatmul.mubr.f32.vlgmr.msra.gmra.mrb[0].mxu1 %v750_v50  ;;  %v770_v54 = vand.u32 4294901760, %v769_v51 }
 0x126   :  { %3084 = vmatpush3.bf16.msra.mxu1 %v3081_v8  ;;  %v760_v53 = vand.u32 4294901760, %v759_v52  ;;  %v1438_v8 = vsub.f32 %v1288_v61, %v1316_v1  ;;  %v2570_v61 = vld [vmem:[%s3679_s2 + $0x68] ss:$0 sm:$0xff] }
 0x127   :  { %3086 = vmatprep.subr.bf16.mxu1 %v3085_v13 }
 0x128   :  { %2826 = vmatprep.mubr.f32.mxu1 %v760_v53  ;;  %v1439_v12 = vand.u32 4294901760, %v1438_v8 }
 0x129   :  { %2827 = vmatmul.mubr.f32.gmra.mrb[2].mxu1 %v770_v54 }
 0x12a   :  { %3088 = vmatpush3.bf16.msra.mxu1 %v3085_v13  ;;  %2837 = vmatprep.mubr.f32.mxu1 %v736_v32 }
 0x12b   :  { %3090 = vmatprep.subr.bf16.mxu1 %v3089_v14 }
 0x12d   :  { %2838 = vmatmul.mubr.f32.vlgmr.msra.gmra.mrb[0].mxu1 %v3474_v31 }
 0x12e   :  { %2840 = vmatprep.mubr.f32.mxu1 %v756_v42  ;;  %3092 = vmatpush3.bf16.msra.mxu1 %v3089_v14 }
 0x12f   :  { %3094 = vmatprep.subr.bf16.mxu1 %v3093_v15 }
 0x131   :  { %2841 = vmatmul.mubr.f32.gmra.mrb[2].mxu1 %v766_v40 }
 0x132   :  { %3096 = vmatpush3.bf16.msra.mxu1 %v3093_v15  ;;  %2851 = vmatprep.mubr.f32.mxu1 %v737_v36  ;;  %v1440_v15 = vsub.f32 %v1438_v8, %v1439_v12 }
 0x133   :  { %3098 = vmatprep.subr.bf16.mxu1 %v3457_v58 }
 0x135   :  { %2852 = vmatmul.mubr.f32.vlgmr.msra.gmra.mrb[0].mxu1 %v747_v34 }
 0x136   :  { %2854 = vmatprep.mubr.f32.mxu1 %v757_v46  ;;  %3100 = vmatpush3.bf16.msra.mxu1 %v3457_v58 }
 0x137   :  { %3102 = vmatprep.subr.bf16.mxu1 %v3459_v59 }
 0x139   :  { %2855 = vmatmul.mubr.f32.gmra.mrb[2].mxu1 %v767_v44 }
 0x13a   :  { %3104 = vmatpush3.bf16.msra.mxu1 %v3459_v59  ;;  %2865 = vmatprep.mubr.f32.mxu1 %v738_v41 }
 0x13b   :  { %3106 = vmatprep.subr.bf16.mxu1 %v3465_v16 }
 0x13d   :  { %2866 = vmatmul.mubr.f32.vlgmr.msra.gmra.mrb[0].mxu1 %v748_v38 }
 0x13e   :  { %2868 = vmatprep.mubr.f32.mxu1 %v758_v49  ;;  %3108 = vmatpush3.bf16.msra.mxu1 %v3465_v16 }
 0x13f   :  { %3110 = vmatprep.subr.bf16.mxu1 %v3467_v17 }
 0x141   :  { %2869 = vmatmul.mubr.f32.gmra.mrb[2].mxu1 %v768_v47 }
 0x142   :  { %3112 = vmatpush3.bf16.msra.mxu1 %v3467_v17  ;;  %2879 = vmatprep.mubr.f32.mxu1 %v736_v32  ;;  %v1441_v17 = vand.u32 4294901760, %v1440_v15 }
 0x143   :  { %3114 = vmatprep.subr.bf16.mxu1 %v3457_v58 }
 0x145   :  { %2880 = vmatmul.mubr.f32.vlgmr.msra.gmra.mrb[0].mxu1 %v3474_v31 }
 0x146   :  { %2882 = vmatprep.mubr.f32.mxu1 %v756_v42  ;;  %3116 = vmatpush3.bf16.msra.mxu1 %v3457_v58  ;;  %v1310_v58 = vand.u32 4294901760, %v1286_v56 }
 0x147   :  { %3118 = vmatprep.subr.bf16.mxu1 %v3459_v59 }
 0x148   :  { %v3500_v60 = vpack.c.bf16 %v1310_v58, %v1307_v57  ;;  %v1424_v63 = vsub.f32 %v1286_v56, %v1310_v58 }
 0x149   :  { %2883 = vmatmul.mubr.f32.gmra.mrb[2].mxu1 %v766_v40 }
 0x14a   :  { %3120 = vmatpush3.bf16.msra.mxu1 %v3459_v59  ;;  %2893 = vmatprep.mubr.f32.mxu1 %v736_v32  ;;  %v1287_v59 = vld [vmem:[%s3679_s2 + $0x48] sm:$0xff]  ;;  %v1425_v3 = vand.u32 4294901760, %v1424_v63  ;;  %v3137_v19 = vpack.c.bf16 %v1424_v63, %v1417_v62 }
 0x14b   :  { %v1313_v0 = vand.u32 4294901760, %v1287_v59  ;;  %3122 = vmatprep.subr.bf16.mxu0 %v3500_v60 }
 0x14c   :  { %3124 = vmatpush3.bf16.msra.mxu0 %v3500_v60  ;;  %v1426_v6 = vsub.f32 %v1424_v63, %v1425_v3  ;;  %v3514_v21 = vpack.c.bf16 %v1425_v3, %v1418_v2 }
 0x14d   :  { %2894 = vmatmul.mubr.f32.vlgmr.msra.gmra.mrb[0].mxu1 %v3474_v31  ;;  %v3510_v4 = vpack.c.bf16 %v1316_v1, %v1313_v0  ;;  %v1431_v7 = vsub.f32 %v1287_v59, %v1313_v0 }
 0x14e   :  { %2896 = vmatprep.mubr.f32.mxu1 %v756_v42  ;;  %v1427_v10 = vand.u32 4294901760, %v1426_v6  ;;  %v3546_v6 = vshrl.u32 %v1953_v5, 7 }
 0x14f   :  { %3126 = vmatprep.subr.bf16.mxu0 %v3510_v4  ;;  %v1432_v11 = vand.u32 4294901760, %v1431_v7  ;;  %v3141_v20 = vpack.c.bf16 %v1438_v8, %v1431_v7  ;;  %v3549_v8 = vand.u32 127, %v1953_v5 }
 0x150   :  { %3128 = vmatpush3.bf16.msra.mxu0 %v3510_v4  ;;  %v3129_v13 = vpack.c.bf16 %v1427_v10, %v1420_v9  ;;  %v1960_v10 = vand.u32 7, %v3546_v6 }
 0x151   :  { %2897 = vmatmul.mubr.f32.gmra.mrb[2].mxu1 %v766_v40  ;;  %v1433_v14 = vsub.f32 %v1431_v7, %v1432_v11  ;;  %v3516_v22 = vpack.c.bf16 %v1439_v12, %v1432_v11  ;;  %v1957_v7 = vadd.s32 8, %v3546_v6 }
 0x152   :  { %3130 = vmatprep.subr.bf16.mxu0 %v3129_v13  ;;  %vm1968_vm6 = vcmp.lt.s32.totalorder %v3549_v8, %v1960_v10  ;;  %vm3566_vm7 = vcmp.ne.s32.totalorder %v3549_v8, %v1960_v10 }
 0x153   :  { %v1434_v16 = vand.u32 4294901760, %v1433_v14  ;;  %v1961_v9 = vand.u32 7, %v1957_v7  ;;  %v2022_v7 = vld [vmem:[%s3678_s1 + $0x8] sm:$0xff] }
 0x155   :  { %v3133_v18 = vpack.c.bf16 %v1441_v17, %v1434_v16  ;;  %vm1969_vm3 = vcmp.lt.s32.totalorder %v3549_v8, %v1961_v9  ;;  %vm3554_vm4 = vcmp.ne.s32.totalorder %v3549_v8, %v1961_v9  ;;  %v1958_v17 = vadd.s32 16, %v3546_v6 }
 0x220   :  { %v2895_v24 = vpop.f32.mrb[0].mxu1 }
 0x221   :  { %v3209_v25 = vadd.f32 %v2895_v24, %v2569_v23  ;;  %v1259_v26 = vpop.f32.mrb[1].mxu1 }
 0x222   :  { %v3210_v27 = vadd.f32 %v2569_v23, %v1259_v26  ;;  %v1962_v26 = vand.u32 7, %v1958_v17 }
 0x223   :  { %3304 = vtanh.f32 %v3209_v25 }
 0x224   :  { %3306 = vtanh.f32 %v3210_v27  ;;  %v2898_v28 = vpop.f32.mrb[2].mxu1  ;;  %vm1970_vm8 = vcmp.lt.s32.totalorder %v3549_v8, %v1962_v26  ;;  %vm3577_vm10 = vcmp.ne.s32.totalorder %v3549_v8, %v1962_v26 }
 0x225   :  { %v3211_v29 = vadd.f32 %v2898_v28, %v2569_v23  ;;  %v1271_v30 = vpop.f32.mrb[3].mxu1 }
 0x226   :  { %v3212_v31 = vadd.f32 %v2569_v23, %v1271_v30 }
 0x227   :  { %3308 = vtanh.f32 %v3211_v29 }
 0x228   :  { %3310 = vtanh.f32 %v3212_v31 }
 0x22d   :  { %v3305_v32 = vpop.eup %3304 }
 0x22e   :  { %v3307_v33 = vpop.eup %3306  ;;  %v1298_v34 = vsel %vm654_vm1, %v3305_v32, 0 }
 0x22f   :  { %v3522_v35 = vand.u32 4294901760, %v1298_v34  ;;  %v1295_v36 = vsel %vm654_vm1, %v3307_v33, 0 }
 0x230   :  { %v1375_v37 = vand.u32 4294901760, %v1295_v36 }
 0x231   :  { %v3309_v38 = vpop.eup %3308  ;;  %v1386_v39 = vsub.f32 %v1298_v34, %v3522_v35 }
 0x232   :  { %v3311_v40 = vpop.eup %3310  ;;  %v1376_v41 = vsub.f32 %v1295_v36, %v1375_v37  ;;  %v1304_v42 = vsel %vm654_vm1, %v3309_v38, 0 }
 0x233   :  { %v1387_v43 = vand.u32 4294901760, %v1386_v39  ;;  %v1301_v44 = vsel %vm654_vm1, %v3311_v40, 0  ;;  %v1405_v45 = vand.u32 4294901760, %v1304_v42 }
 0x234   :  { %v1377_v46 = vand.u32 4294901760, %v1376_v41  ;;  %v1395_v47 = vand.u32 4294901760, %v1301_v44 }
 0x235   :  { %v1388_v48 = vsub.f32 %v1386_v39, %v1387_v43  ;;  %v1406_v49 = vsub.f32 %v1304_v42, %v1405_v45 }
 0x236   :  { %v1378_v50 = vsub.f32 %v1376_v41, %v1377_v46  ;;  %v1396_v51 = vsub.f32 %v1301_v44, %v1395_v47 }
 0x237   :  { %v1407_v52 = vand.u32 4294901760, %v1406_v49  ;;  %v1389_v55 = vand.u32 4294901760, %v1388_v48 }
 0x238   :  { %v1379_v53 = vand.u32 4294901760, %v1378_v50  ;;  %v1397_v54 = vand.u32 4294901760, %v1396_v51 }
 0x239   :  { %v1408_v56 = vsub.f32 %v1406_v49, %v1407_v52 }
 0x23a   :  { %2907 = vmatprep.mubr.f32.mxu0 %v1379_v53  ;;  %v1398_v57 = vsub.f32 %v1396_v51, %v1397_v54 }
 0x23b   :  { %2908 = vmatmul.mubr.f32.vlgmr.msra.gmra.mrb[4].mxu0 %v1389_v55  ;;  %v1409_v59 = vand.u32 4294901760, %v1408_v56 }
 0x23c   :  { %3132 = vmatpush3.bf16.msra.mxu0 %v3129_v13  ;;  %v1399_v58 = vand.u32 4294901760, %v1398_v57 }
 0x23d   :  { %3134 = vmatprep.subr.bf16.mxu0 %v3133_v18 }
 0x23e   :  { %2910 = vmatprep.mubr.f32.mxu0 %v1399_v58 }
 0x23f   :  { %2911 = vmatmul.mubr.f32.gmra.mrb[6].mxu0 %v1409_v59 }
 0x240   :  { %3136 = vmatpush3.bf16.msra.mxu0 %v3133_v18  ;;  %2921 = vmatprep.mubr.f32.mxu0 %v1375_v37  ;;  %v1959_v18 = vadd.s32 24, %v3546_v6 }
 0x241   :  { %3138 = vmatprep.subr.bf16.mxu0 %v3137_v19 }
 0x242   :  { %v1963_v27 = vand.u32 7, %v1959_v18  ;;  %v3355_v18 = vmov 0.0|0.0  }
 0x243   :  { %2922 = vmatmul.mubr.f32.vlgmr.msra.gmra.mrb[4].mxu0 %v3522_v35  ;;  %3169 = vmatprep.subr.bf16.mxu1 %v3355_v18 }
 0x244   :  { %2924 = vmatprep.mubr.f32.mxu0 %v1395_v47  ;;  %3140 = vmatpush3.bf16.msra.mxu0 %v3137_v19  ;;  %vm1971_vm9 = vcmp.lt.s32.totalorder %v3549_v8, %v1963_v27  ;;  %vm3584_vm11 = vcmp.ne.s32.totalorder %v3549_v8, %v1963_v27 }
 0x245   :  { %3142 = vmatprep.subr.bf16.mxu0 %v3141_v20 }
 0x247   :  { %2925 = vmatmul.mubr.f32.gmra.mrb[6].mxu0 %v1405_v45 }
 0x248   :  { %3144 = vmatpush3.bf16.msra.mxu0 %v3141_v20  ;;  %2935 = vmatprep.mubr.f32.mxu0 %v1376_v41 }
 0x249   :  { %3146 = vmatprep.subr.bf16.mxu0 %v3500_v60 }
 0x24b   :  { %2936 = vmatmul.mubr.f32.vlgmr.msra.gmra.mrb[4].mxu0 %v1386_v39 }
 0x24c   :  { %2938 = vmatprep.mubr.f32.mxu0 %v1396_v51  ;;  %3148 = vmatpush3.bf16.msra.mxu0 %v3500_v60 }
 0x24d   :  { %3150 = vmatprep.subr.bf16.mxu0 %v3510_v4 }
 0x24f   :  { %2939 = vmatmul.mubr.f32.gmra.mrb[6].mxu0 %v1406_v49 }
 0x250   :  { %3152 = vmatpush3.bf16.msra.mxu0 %v3510_v4  ;;  %2949 = vmatprep.mubr.f32.mxu0 %v1377_v46 }
 0x251   :  { %3154 = vmatprep.subr.bf16.mxu0 %v3514_v21 }
 0x253   :  { %2950 = vmatmul.mubr.f32.vlgmr.msra.gmra.mrb[4].mxu0 %v1387_v43 }
 0x254   :  { %2952 = vmatprep.mubr.f32.mxu0 %v1397_v54  ;;  %3156 = vmatpush3.bf16.msra.mxu0 %v3514_v21 }
 0x255   :  { %3158 = vmatprep.subr.bf16.mxu0 %v3516_v22 }
 0x257   :  { %2953 = vmatmul.mubr.f32.gmra.mrb[6].mxu0 %v1407_v52 }
 0x258   :  { %3160 = vmatpush3.bf16.msra.mxu0 %v3516_v22  ;;  %2963 = vmatprep.mubr.f32.mxu0 %v1375_v37 }
 0x259   :  { %3162 = vmatprep.subr.bf16.mxu0 %v3500_v60 }
 0x25b   :  { %2964 = vmatmul.mubr.f32.vlgmr.msra.gmra.mrb[4].mxu0 %v3522_v35 }
 0x25c   :  { %2966 = vmatprep.mubr.f32.mxu0 %v1395_v47  ;;  %3164 = vmatpush3.bf16.msra.mxu0 %v3500_v60 }
 0x25d   :  { %3166 = vmatprep.subr.bf16.mxu0 %v3510_v4 }
 0x25f   :  { %2967 = vmatmul.mubr.f32.gmra.mrb[6].mxu0 %v1405_v45 }
 0x260   :  { %3168 = vmatpush3.bf16.msra.mxu0 %v3510_v4  ;;  %2977 = vmatprep.mubr.f32.mxu0 %v1375_v37 }
 0x263   :  { %2978 = vmatmul.mubr.f32.vlgmr.msra.gmra.mrb[4].mxu0 %v3522_v35 }
 0x264   :  { %2980 = vmatprep.mubr.f32.mxu0 %v1395_v47 }
 0x267   :  { %2981 = vmatmul.mubr.f32.gmra.mrb[6].mxu0 %v1405_v45 }
 0x336   :  { %v2979_v62 = vpop.f32.mrb[4].mxu0 }
 0x337   :  { %v3213_v63 = vadd.f32 %v2979_v62, %v2570_v61  ;;  %v1898_v0 = vpop.f32.mrb[5].mxu0 }
 0x338   :  { %v3214_v1 = vadd.f32 %v2570_v61, %v1898_v0 }
 0x339   :  { %1938 = vrot.lane.b32.xlu1 %v3213_v63, %s3352_s20  ;;  %1926 = vrot.lane.b32.xlu0 %v3213_v63, %s3353_s21 }
 0x33a   :  { %v2982_v60 = vpop.f32.mrb[6].mxu0 }
 0x33b   :  { %v1910_v2 = vpop.f32.mrb[7].mxu0  ;;  %v3215_v3 = vadd.f32 %v2982_v60, %v2570_v61 }
 0x33c   :  { %v3216_v4 = vadd.f32 %v2570_v61, %v1910_v2 }
 0x33d   :  { %1936 = vrot.lane.b32.xlu1 %v3214_v1, %s3352_s20  ;;  %1924 = vrot.lane.b32.xlu0 %v3214_v1, %s3353_s21 }
 0x341   :  { %1930 = vrot.lane.b32.xlu1 %v3215_v3, %s3353_s21  ;;  %1928 = vrot.lane.b32.xlu0 %v3216_v4, %s3353_s21 }
 0x345   :  { %1942 = vrot.lane.b32.xlu1 %v3215_v3, %s3352_s20  ;;  %1940 = vrot.lane.b32.xlu0 %v3216_v4, %s3352_s20 }
 0x3ab   :  { %v1939_v11 = vpop.permute.xlu1 %1938  ;;  %v1927_v12 = vpop.permute.xlu0 %1926 }
 0x3ac   :  { %v1950_v14 = vsel %vm1948_vm2, %v1927_v12, %v1939_v11  ;;  %v2021_v12 = vld [vmem:[%s3678_s1] sm:$0xff] }
 0x3ad   :  { %v1973_v15 = vsel %vm1969_vm3, %v3213_v63, %v1950_v14 }
 0x3ae   :  { %v1977_v16 = vsel %vm3554_vm4, %v1973_v15, -inf }
 0x3af   :  { %v1937_v19 = vpop.permute.xlu1 %1936  ;;  %v1925_v20 = vpop.permute.xlu0 %1924  ;;  %v1984_v21 = vsel %vm1980_vm5, %v1977_v16, -inf  ;;  %v2023_v16 = vld [vmem:[%s3678_s1 + $0x10] sm:$0xff] }
 0x3b0   :  { %v1949_v23 = vsel %vm1948_vm2, %v1925_v20, %v1937_v19  ;;  %1985 = vmax.xlane.f32.xlu1 %v1984_v21  ;;  %v2024_v20 = vld [vmem:[%s3678_s1 + $0x18] sm:$0xff]  ;;  %s3358_s1 = smov [#allocation2]  }
 0x3b1   :  { %v1972_v24 = vsel %vm1968_vm6, %v3214_v1, %v1949_v23  ;;  %v3357_v23 = vmov 0.0   ;;  %s2560_s28 = sshll.u32 %s3358_s1, 4  ;;  %s2561_s28 = int_to_ptr.vmem [resolvable:$true] %s2560_s28 }
 0x3b2   :  { %v1976_v25 = vsel %vm3566_vm7, %v1972_v24, -inf  ;;  %2991 = vmatprep.mubr.msk.f32.mxu1 %vm3356_vm12, %v3357_v23  ;;  %s3328_s29 = scalar_lea.vmem %s2561_s28, 64  ;;  %p3333_p1 = scmp.lt.s32.totalorder %s2561_s28, %s2561_s28 }
 0x3b3   :  { %v1931_v28 = vpop.permute.xlu1 %1930  ;;  %v1929_v29 = vpop.permute.xlu0 %1928  ;;  %v1981_v30 = vsel %vm1980_vm5, %v1976_v25, -inf  ;;  %p3329_p0 = scmp.ne.s32.totalorder %s2561_s28, %s3328_s29  ;;  %p3334_p2 = scmp.lt.s32.totalorder %s3328_s29, %s3328_s29 }
 0x3b4   :  { %1982 = vmax.xlane.f32.xlu0 %v1981_v30 }
 0x3b5   :  { %p3335_p3 = por %p3334_p2, %p3333_p1 }
 0x3b7   :  { %v1943_v31 = vpop.permute.xlu1 %1942  ;;  %v1941_v32 = vpop.permute.xlu0 %1940  ;;  %p3336_p4 = pnand %p3335_p3, %p3329_p0 }
 0x3b8   :  { %v1952_v34 = vsel %vm1948_vm2, %v1931_v28, %v1943_v31  ;;  %v1951_v35 = vsel %vm1948_vm2, %v1929_v29, %v1941_v32 }
 0x3b9   :  { %v1974_v36 = vsel %vm1970_vm8, %v3216_v4, %v1951_v35  ;;  %v1975_v38 = vsel %vm1971_vm9, %v3215_v3, %v1952_v34  ;;  %v3354_v3 = vmov 0  }
 0x3ba   :  { %v1978_v39 = vsel %vm3577_vm10, %v1974_v36, -inf  ;;  %v1979_v41 = vsel %vm3584_vm11, %v1975_v38, -inf  ;;  %3295 = vset.pattern.permute.xlu0 %v3354_v3  ;;  %3294 = vset.pattern.permute.xlu1 %v3354_v3 }
 0x3bb   :  { %v1987_v40 = vsel %vm1980_vm5, %v1978_v39, -inf  ;;  %v1990_v42 = vsel %vm1980_vm5, %v1979_v41, -inf }
 0x3bc   :  { %1988 = vmax.xlane.f32.xlu0 %v1987_v40 }
 0x3c0   :  { %1991 = vmax.xlane.f32.xlu0 %v1990_v42 }
 0x43d   :  { %v1986_v43 = vpop.xlane.xlu1 %1985 }
 0x43e   :  { %v1994_v44 = vsub.f32 %v1973_v15, %v1986_v43 }
 0x440   :  { %v1999_v45 = vmul.f32 1.442695, %v1994_v44 }
 0x441   :  { %v1983_v46 = vpop.xlane.xlu0 %1982 }
 0x442   :  { %3312 = vpow2.f32 %v1999_v45  ;;  %v1993_v47 = vsub.f32 %v1972_v24, %v1983_v46  ;;  %v2057_v24 = vmul.u32 8, %v3546_v6 }
 0x444   :  { %v1997_v48 = vmul.f32 1.442695, %v1993_v47  ;;  %v2059_v25 = vadd.s32 8, %v2057_v24  ;;  %vm2058_vm13 = vcmp.ge.s32.totalorder %v3549_v8, %v2057_v24 }
 0x446   :  { %3314 = vpow2.f32 %v1997_v48  ;;  %vm2060_vm14 = vcmp.lt.s32.totalorder %v3549_v8, %v2059_v25 }
 0x447   :  { %vm2061_vm15 = vmand %vm2058_vm13, %vm2060_vm14 }
 0x448   :  { %v3628_v29 = vsel %vm2061_vm15, 1.0, %v3357_v23 }
 0x449   :  { %v1989_v49 = vpop.xlane.xlu0 %1988  ;;  %v2065_v33 = vsel %vm654_vm1, %v3628_v29, 0 }
 0x44a   :  { %v1995_v50 = vsub.f32 %v1974_v36, %v1989_v49  ;;  %v2137_v35 = vsub.f32 %v2065_v33, %v2065_v33 }
 0x44c   :  { %v3313_v51 = vpop.eup %3312  ;;  %v2001_v52 = vmul.f32 1.442695, %v1995_v50  ;;  %v2138_v39 = vand.u32 4294901760, %v2137_v35 }
 0x44d   :  { %v1992_v53 = vpop.xlane.xlu0 %1991  ;;  %v2006_v54 = vsel %vm3554_vm4, %v3313_v51, 0.0 }
 0x44e   :  { %3316 = vpow2.f32 %v2001_v52  ;;  %v1996_v55 = vsub.f32 %v1975_v38, %v1992_v53  ;;  %v2012_v56 = vsel %vm1980_vm5, %v2006_v54, 0.0  ;;  %v2139_v46 = vsub.f32 %v2137_v35, %v2138_v39 }
 0x44f   :  { %2013 = vadd.xlane.f32.xlu0 %v2012_v56 }
 0x450   :  { %v3315_v57 = vpop.eup %3314  ;;  %v2003_v58 = vmul.f32 1.442695, %v1996_v55  ;;  %v2140_v53 = vand.u32 4294901760, %v2139_v46 }
 0x451   :  { %v2005_v59 = vsel %vm3566_vm7, %v3315_v57, 0.0 }
 0x452   :  { %3318 = vpow2.f32 %v2003_v58  ;;  %v2009_v61 = vsel %vm1980_vm5, %v2005_v59, 0.0 }
 0x453   :  { %2010 = vadd.xlane.f32.xlu1 %v2009_v61 }
 0x458   :  { %v3317_v62 = vpop.eup %3316 }
 0x459   :  { %v2007_v63 = vsel %vm3577_vm10, %v3317_v62, 0.0 }
 0x45a   :  { %v2015_v0 = vsel %vm1980_vm5, %v2007_v63, 0.0 }
 0x45b   :  { %2016 = vadd.xlane.f32.xlu1 %v2015_v0 }
 0x45c   :  { %v3319_v60 = vpop.eup %3318 }
 0x45d   :  { %v3605_v1 = vsel %vm3584_vm11, %v3319_v60, 0.0 }
 0x45e   :  { %v2018_v2 = vsel %vm1980_vm5, %v3605_v1, 0.0 }
 0x45f   :  { %2019 = vadd.xlane.f32.xlu0 %v2018_v2 }
 0x4dc   :  { %v2014_v4 = vpop.xlane.xlu0 %2013 }
 0x4dd   :  { %3320 = vrcp.f32 %v2014_v4 }
 0x4e0   :  { %v2011_v5 = vpop.xlane.xlu1 %2010 }
 0x4e1   :  { %3322 = vrcp.f32 %v2011_v5 }
 0x4e7   :  { %v3321_v9 = vpop.eup %3320 }
 0x4e8   :  { %v2017_v10 = vpop.xlane.xlu1 %2016  ;;  %v2030_v11 = vmul.f32 %v3321_v9, %v2022_v7 }
 0x4e9   :  { %3324 = vrcp.f32 %v2017_v10 }
 0x4ea   :  { %2040 = vperm.xlu0 %3295, %v2030_v11  }
 0x4eb   :  { %v3323_v13 = vpop.eup %3322 }
 0x4ec   :  { %v2020_v14 = vpop.xlane.xlu0 %2019  ;;  %v2029_v15 = vmul.f32 %v3323_v13, %v2021_v12 }
 0x4ed   :  { %3326 = vrcp.f32 %v2020_v14 }
 0x4ee   :  { %2035 = vperm.xlu1 %3294, %v2029_v15  }
 0x4f3   :  { %v3325_v17 = vpop.eup %3324 }
 0x4f4   :  { %v2031_v19 = vmul.f32 %v3325_v17, %v2023_v16 }
 0x4f6   :  { %2045 = vperm.xlu1 %3294, %v2031_v19  }
 0x4f7   :  { %v3327_v21 = vpop.eup %3326 }
 0x4f8   :  { %v2032_v22 = vmul.f32 %v3327_v21, %v2024_v20 }
 0x4fa   :  { %2050 = vperm.xlu1 %3294, %v2032_v22  }
 0x569   :  { %v2041_v26 = vpop.permute.xlu0 %2040 }
 0x56a   :  { %v2054_v27 = vmul.f32 %v2041_v26, %v2006_v54 }
 0x56c   :  { %v2071_v31 = vand.u32 4294901760, %v2054_v27 }
 0x56d   :  { %v2036_v28 = vpop.permute.xlu1 %2035 }
 0x56e   :  { %v2053_v30 = vmul.f32 %v2036_v28, %v2005_v59  ;;  %v2155_v36 = vsub.f32 %v2054_v27, %v2071_v31 }
 0x570   :  { %v2068_v32 = vand.u32 4294901760, %v2053_v30  ;;  %v2156_v40 = vand.u32 4294901760, %v2155_v36 }
 0x572   :  { %v3632_v34 = vpack.c.bf16 %v2071_v31, %v2068_v32  ;;  %v2148_v6 = vsub.f32 %v2053_v30, %v2068_v32  ;;  %v2157_v47 = vsub.f32 %v2155_v36, %v2156_v40 }
 0x574   :  { %3171 = vmatpush3.bf16.msra.mxu1 %v3632_v34  ;;  %v2149_v37 = vand.u32 4294901760, %v2148_v6  ;;  %v2158_v54 = vand.u32 4294901760, %v2157_v47 }
 0x575   :  { %v2046_v8 = vpop.permute.xlu1 %2045  ;;  %3172 = vmatprep.subr.bf16.mxu1 %v3355_v18 }
 0x576   :  { %v2055_v38 = vmul.f32 %v2046_v8, %v2007_v63  ;;  %v2150_v43 = vsub.f32 %v2148_v6, %v2149_v37  ;;  %v3182_v63 = vpack.c.bf16 %v2155_v36, %v2148_v6  ;;  %v3194_v60 = vpack.c.bf16 %v2156_v40, %v2149_v37 }
 0x578   :  { %v2074_v41 = vand.u32 4294901760, %v2055_v38  ;;  %v2151_v50 = vand.u32 4294901760, %v2150_v43 }
 0x579   :  { %v2051_v42 = vpop.permute.xlu1 %2050 }
 0x57a   :  { %v2162_v44 = vsub.f32 %v2055_v38, %v2074_v41  ;;  %v2056_v45 = vmul.f32 %v2051_v42, %v3605_v1  ;;  %v3176_v58 = vpack.c.bf16 %v2158_v54, %v2151_v50 }
 0x57c   :  { %v2163_v48 = vand.u32 4294901760, %v2162_v44  ;;  %v2077_v49 = vand.u32 4294901760, %v2056_v45 }
 0x57e   :  { %v3173_v51 = vpack.c.bf16 %v2077_v49, %v2074_v41  ;;  %v2169_v52 = vsub.f32 %v2056_v45, %v2077_v49  ;;  %v2164_v55 = vsub.f32 %v2162_v44, %v2163_v48 }
 0x580   :  { %v2170_v56 = vand.u32 4294901760, %v2169_v52  ;;  %3174 = vmatpush3.bf16.msra.mxu1 %v3173_v51  ;;  %v2165_v59 = vand.u32 4294901760, %v2164_v55  ;;  %v3185_v0 = vpack.c.bf16 %v2169_v52, %v2162_v44 }
 0x581   :  { %3175 = vmatprep.subr.bf16.mxu1 %v3355_v18 }
 0x582   :  { %v2171_v57 = vsub.f32 %v2169_v52, %v2170_v56  ;;  %v3197_v1 = vpack.c.bf16 %v2170_v56, %v2163_v48 }
 0x583   :  { %2992 = vmatmul.mubr.f32.vlgmr.msra.gmra.mrb[4].mxu1 %v2140_v53 }
 0x584   :  { %v2172_v61 = vand.u32 4294901760, %v2171_v57  ;;  %3177 = vmatpush3.bf16.msra.mxu1 %v3176_v58  ;;  %3002 = vmatprep.mubr.msk.f32.mxu1 %vm3356_vm12, %v3357_v23 }
 0x585   :  { %3178 = vmatprep.subr.bf16.mxu1 %v3355_v18 }
 0x586   :  { %v3179_v62 = vpack.c.bf16 %v2172_v61, %v2165_v59 }
 0x588   :  { %3180 = vmatpush3.bf16.msra.mxu1 %v3179_v62 }
 0x589   :  { %3181 = vmatprep.subr.bf16.mxu1 %v3355_v18 }
 0x58b   :  { %3003 = vmatmul.mubr.msk.f32.vlgmr.msra.gmra.mrb[4].mxu1 %vm654_vm1, %v3628_v29 }
 0x58c   :  { %3183 = vmatpush3.bf16.msra.mxu1 %v3182_v63  ;;  %3013 = vmatprep.mubr.msk.f32.mxu1 %vm3356_vm12, %v3357_v23 }
 0x58d   :  { %3184 = vmatprep.subr.bf16.mxu1 %v3355_v18 }
 0x590   :  { %3186 = vmatpush3.bf16.msra.mxu1 %v3185_v0 }
 0x591   :  { %3187 = vmatprep.subr.bf16.mxu1 %v3355_v18 }
 0x593   :  { %3014 = vmatmul.mubr.f32.vlgmr.msra.gmra.mrb[4].mxu1 %v2137_v35 }
 0x594   :  { %3189 = vmatpush3.bf16.msra.mxu1 %v3632_v34  ;;  %3024 = vmatprep.mubr.msk.f32.mxu1 %vm3356_vm12, %v3357_v23 }
 0x595   :  { %3190 = vmatprep.subr.bf16.mxu1 %v3355_v18 }
 0x598   :  { %3192 = vmatpush3.bf16.msra.mxu1 %v3173_v51 }
 0x599   :  { %3193 = vmatprep.subr.bf16.mxu1 %v3355_v18 }
 0x59b   :  { %3025 = vmatmul.mubr.f32.vlgmr.msra.gmra.mrb[4].mxu1 %v2138_v39 }
 0x59c   :  { %3195 = vmatpush3.bf16.msra.mxu1 %v3194_v60  ;;  %3035 = vmatprep.mubr.msk.f32.mxu1 %vm3356_vm12, %v3357_v23 }
 0x59d   :  { %3196 = vmatprep.subr.bf16.mxu1 %v3355_v18 }
 0x5a0   :  { %3198 = vmatpush3.bf16.msra.mxu1 %v3197_v1 }
 0x5a1   :  { %3199 = vmatprep.subr.bf16.mxu1 %v3355_v18 }
 0x5a3   :  { %3036 = vmatmul.mubr.msk.f32.vlgmr.msra.gmra.mrb[4].mxu1 %vm654_vm1, %v3628_v29 }
 0x5a4   :  { %3201 = vmatpush3.bf16.msra.mxu1 %v3632_v34  ;;  %3046 = vmatprep.mubr.msk.f32.mxu1 %vm3356_vm12, %v3357_v23 }
 0x5a5   :  { %3202 = vmatprep.subr.bf16.mxu1 %v3355_v18 }
 0x5a8   :  { %3204 = vmatpush3.bf16.msra.mxu1 %v3173_v51 }
 0x5ab   :  { %3047 = vmatmul.mubr.msk.f32.vlgmr.msra.gmra.mrb[4].mxu1 %vm654_vm1, %v3628_v29 }
 0x67e   :  { %v2548_v2 = vpop.f32.mrb[4].mxu1 }
 0x67f   :  { %2553 = vst.msk [vmem:[#allocation2] sm:$0xf] %vm2552_vm0, %v2548_v2  ;;  %v3048_v3 = vpop.f32.mrb[5].mxu1 }
 0x680   :  { %3339 = shalt.err (!%p3336_p4)
}
 0x681   :  { %s3340_s5 = scalar_lea.hbm %s3680_s3, 64 }
 0x682   :  { %p3341_p5 = scmp.ne.s32.totalorder %s3680_s3, %s3340_s5  ;;  %p3344_p6 = scmp.lt.u32.totalorder %s3340_s5, %s3680_s3 }
 0x684   :  { %p3346_p7 = pnand %p3344_p6, %p3341_p5 }
 0x686   :  { %3349 = shalt.err (!%p3346_p7)
}
 0x687   :  { %2563 = dma.vmem_to_hbm [thread:$0]  %s2561_s28, 64, %s3680_s3, [#allocation3]  }
 0x688   :  { %3350 = dma.done.wait [#allocation3], 64  }
 0x689   :  { %3351 = vsyncadd [#allocation3], 4294967232 }
 0x68a   :  { %2567 = vsyncpa [#allocation3], 1 }

</bundles_post_ra>
